<compile_context>
chip_gen: v7x
topology: tpu7x:2x2x1
jax: 0.10.0
libtpu: 0.0.40
codegen_flags: <defaults>
</compile_context>

<pallas_src>
import jax
import jax.numpy as jnp
from jax import lax
from jax.experimental import pallas as pl
from jax.experimental.pallas import tpu as pltpu


def _round_up(x, m):
    return ((x + m - 1) // m) * m


# ---------------------- primary: one-hot (MXU) gather ------------------------
def _embed_onehot_kernel(ids_ref, emb_ref, pe_ref, out_ref):
    # ids_ref: VMEM (T, 1) int32   token ids for this tile
    # emb_ref: VMEM (V, D) f32     whole embedding table (resident)
    # pe_ref:  VMEM (S, D) f32     positional-encoding rows 0..S-1 (resident)
    # out_ref: VMEM (T, D) f32     output tile
    T = out_ref.shape[0]
    V = emb_ref.shape[0]
    S = pe_ref.shape[0]
    base = pl.program_id(0) * T

    ids = ids_ref[...]                                                # (T, 1)
    onehot_tok = (ids == lax.broadcasted_iota(jnp.int32, (T, V), 1)
                  ).astype(jnp.float32)                               # (T, V)
    emb_rows = jnp.dot(onehot_tok, emb_ref[...],
                       preferred_element_type=jnp.float32,
                       precision=lax.Precision.HIGHEST)               # (T, D)

    pos = (base + lax.broadcasted_iota(jnp.int32, (T, 1), 0)) % S     # (T, 1)
    onehot_pos = (pos == lax.broadcasted_iota(jnp.int32, (T, S), 1)
                  ).astype(jnp.float32)                               # (T, S)
    pe_rows = jnp.dot(onehot_pos, pe_ref[...],
                      preferred_element_type=jnp.float32,
                      precision=lax.Precision.HIGHEST)                # (T, D)

    out_ref[...] = (emb_rows + pe_rows).astype(out_ref.dtype)


# --------------- fallback: scalar-prefetched per-row gather ------------------
def _embed_gather_kernel(ids_sref, emb_ref, pe_ref, out_ref):
    # ids_sref: SMEM (N_pad,) int32 scalar-prefetched flattened token ids
    T = out_ref.shape[0]
    S = pe_ref.shape[0]
    base = pl.program_id(0) * T

    def body(t, carry):
        flat = base + t
        tok = ids_sref[flat]
        pos = flat % S
        out_ref[pl.ds(t, 1), :] = (emb_ref[pl.ds(tok, 1), :]
                                   + pe_ref[pl.ds(pos, 1), :])
        return carry

    lax.fori_loop(0, T, body, 0, unroll=8)


# --------------------------------- wrapper -----------------------------------
def transformer_embedding_forward(ids, emb_table, pe_table, *,
                                  tile_tokens=256, onehot_vocab_limit=2048):
    """ids: (B, S) int32, emb_table: (V, D) f32, pe_table: (max_len, D) f32.
    Returns (B, S, D) f32 = emb_table[ids] + pe_table[:S] (dropout eval = id)."""
    B, S = ids.shape
    V, D = emb_table.shape
    N = B * S

    # Tokens per grid step: sublane-dense (multiple of 8), capped at tile_tokens.
    T = min(_round_up(tile_tokens, 8), _round_up(N, 8))
    num_tiles = pl.cdiv(N, T)
    N_pad = num_tiles * T

    # Flatten ids, clamp to the valid vocab range (OOB safety), pad to N_pad.
    ids_flat = jnp.clip(ids.reshape(-1).astype(jnp.int32), 0, V - 1)
    if N_pad != N:
        ids_flat = jnp.concatenate([ids_flat, jnp.zeros((N_pad - N,), jnp.int32)])

    emb_res = emb_table.astype(jnp.float32)      # (V, D), VMEM-resident
    pe_res = pe_table[:S].astype(jnp.float32)    # (S, D), VMEM-resident

    # VMEM budget: resident tables (x2 headroom) + double-buffered tiles + slack.
    resident_bytes = 4 * (V * D + S * D)
    tile_bytes = 4 * (2 * T * D + 2 * T + T * V + T * S)
    vmem_limit = int(min(max(2 * resident_bytes + tile_bytes + (4 << 20),
                             16 << 20), 64 << 20))

    if V <= onehot_vocab_limit:
        ids_col = ids_flat.reshape(N_pad, 1)
        grid_spec = pltpu.PrefetchScalarGridSpec(
            num_scalar_prefetch=0,
            grid=(num_tiles,),
            in_specs=[
                pl.BlockSpec((T, 1), lambda i: (i, 0)),   # token ids, tiled
                pl.BlockSpec((V, D), lambda i: (0, 0)),   # resident table
                pl.BlockSpec((S, D), lambda i: (0, 0)),   # resident PE rows
            ],
            out_specs=pl.BlockSpec((T, D), lambda i: (i, 0)),
        )
        out_flat = pl.pallas_call(
            _embed_onehot_kernel,
            out_shape=jax.ShapeDtypeStruct((N_pad, D), jnp.float32),
            grid_spec=grid_spec,
            compiler_params=pltpu.CompilerParams(
                dimension_semantics=("parallel",),
                vmem_limit_bytes=vmem_limit,
            ),
        )(ids_col, emb_res, pe_res)
    else:
        # TODO(synk): replace residency with a manual double-buffered HBM row
        #             gather (pl.ANY + pltpu.make_async_copy) for huge tables.
        grid_spec = pltpu.PrefetchScalarGridSpec(
            num_scalar_prefetch=1,
            grid=(num_tiles,),
            in_specs=[
                pl.BlockSpec((V, D), lambda i, ids_ref: (0, 0)),
                pl.BlockSpec((S, D), lambda i, ids_ref: (0, 0)),
            ],
            out_specs=pl.BlockSpec((T, D), lambda i, ids_ref: (i, 0)),
        )
        out_flat = pl.pallas_call(
            _embed_gather_kernel,
            out_shape=jax.ShapeDtypeStruct((N_pad, D), jnp.float32),
            grid_spec=grid_spec,
            compiler_params=pltpu.CompilerParams(
                dimension_semantics=("parallel",),
                vmem_limit_bytes=vmem_limit,
            ),
        )(ids_flat, emb_res, pe_res)

    # Dropout (eval mode) = identity.
    return out_flat[:N].reshape(B, S, D)


# --------------------------- parameter construction --------------------------
def make_positional_encoding(max_len, d_model):
    # Reproduces the PyTorch code exactly (including its formula:
    # pos * 10000 ** (division / d_model), note the multiplication).
    pos = jnp.arange(0, max_len, dtype=jnp.float32)[:, None]           # (max_len, 1)
    division = jnp.arange(0, d_model, 2, dtype=jnp.float32)            # (d_model/2,)
    angles = pos * (10000.0 ** (division / d_model))                   # (max_len, d_model/2)
    pe = jnp.zeros((max_len, d_model), dtype=jnp.float32)
    pe = pe.at[:, 0::2].set(jnp.sin(angles))
    pe = pe.at[:, 1::2].set(jnp.cos(angles))
    return pe


def make_token_embedding(key, vocab_size, d_model, padding_idx=2):
    # nn.Embedding default init: N(0, 1); padding_idx row zeroed.
    w = jax.random.normal(key, (vocab_size, d_model), dtype=jnp.float32)
    w = w.at[padding_idx, :].set(0.0)
    return w


# ------------------------------------ main -----------------------------------
if __name__ == "__main__":
    vocab_size = 32
    d_model = 128
    max_len = 64
    batch = 2
    seq = 8

    key = jax.random.PRNGKey(0)
    k_emb, k_ids = jax.random.split(key)

    emb_table = make_token_embedding(k_emb, vocab_size, d_model)
    pe_table = make_positional_encoding(max_len, d_model)
    ids = jax.random.randint(k_ids, (batch, seq), 0, vocab_size, dtype=jnp.int32)

    out = transformer_embedding_forward(ids, emb_table, pe_table)
    out = jax.block_until_ready(out)

    # reference check (plain JAX)
    ref = emb_table[ids] + pe_table[:seq][None, :, :]
    assert out.shape == (batch, seq, d_model)
    assert jnp.allclose(out, ref, atol=1e-5, rtol=1e-5), "mismatch vs reference"

    print("KERNEL_OK")
</pallas_src>

<mosaic_0001>
module attributes {stable_mosaic.version = 11 : i64} {
  func.func @_embed_onehot_kernel(%arg0: i32, %arg1: memref<16x1xi32, #tpu.memory_space<vmem>>, %arg2: memref<32x128xf32, #tpu.memory_space<vmem>>, %arg3: memref<8x128xf32, #tpu.memory_space<vmem>>, %arg4: memref<16x128xf32, #tpu.memory_space<vmem>>) attributes {dimension_semantics = [#tpu.dimension_semantics<parallel>], iteration_bounds = array<i64: 1>, scalar_prefetch = 0 : i64, scratch_operands = 0 : i64, tpu.core_type = #tpu.core_type<tc>, window_params = [{transform_indices = @transform_0, window_bounds = array<i64: 16, 1>}, {pipeline_mode = #tpu.pipeline_mode<synchronous>, transform_indices = @transform_1, window_bounds = array<i64: 32, 128>}, {pipeline_mode = #tpu.pipeline_mode<synchronous>, transform_indices = @transform_2, window_bounds = array<i64: 8, 128>}, {transform_indices = @transform_3, window_bounds = array<i64: 16, 128>}]} {
    %c16_i32 = arith.constant 16 : i32
    %0 = arith.muli %arg0, %c16_i32 : i32
    %c0 = arith.constant 0 : index
    %c0_0 = arith.constant 0 : index
    %1 = vector.load %arg1[%c0, %c0_0] : memref<16x1xi32, #tpu.memory_space<vmem>>, vector<16x1xi32>
    %2 = tpu.iota {dimensions = array<i32: 1>} : vector<16x32xi32>
    %3 = vector.broadcast %1 : vector<16x1xi32> to vector<16x32xi32>
    %4 = arith.cmpi eq, %3, %2 : vector<16x32xi32>
    %5 = arith.extui %4 : vector<16x32xi1> to vector<16x32xi32>
    %6 = arith.sitofp %5 : vector<16x32xi32> to vector<16x32xf32>
    %c0_1 = arith.constant 0 : index
    %c0_2 = arith.constant 0 : index
    %7 = vector.load %arg2[%c0_1, %c0_2] : memref<32x128xf32, #tpu.memory_space<vmem>>, vector<32x128xf32>
    %cst = arith.constant dense<0.000000e+00> : vector<16x128xf32>
    %8 = tpu.matmul %6, %7, %cst {dimension_numbers = #tpu.dot_dimension_numbers<[1], [0], [0], [1], [0, 0, 1, 1], [], []>, precision = #tpu.contract_precision<fp32>} : vector<16x32xf32>, vector<32x128xf32>, vector<16x128xf32> -> vector<16x128xf32>
    %9 = tpu.iota {dimensions = array<i32: 0>} : vector<16x1xi32>
    %10 = vector.broadcast %0 : i32 to vector<16x1xi32>
    %11 = arith.addi %10, %9 : vector<16x1xi32>
    %c8_i32 = arith.constant 8 : i32
    %c0_i32 = arith.constant 0 : i32
    %12 = arith.cmpi eq, %c8_i32, %c0_i32 : i32
    %c1_i32 = arith.constant 1 : i32
    %13 = arith.select %12, %c1_i32, %c8_i32 : i32
    %14 = vector.broadcast %13 : i32 to vector<16x1xi32>
    %15 = arith.remsi %11, %14 : vector<16x1xi32>
    %c0_i32_3 = arith.constant 0 : i32
    %16 = vector.broadcast %c0_i32_3 : i32 to vector<16x1xi32>
    %17 = arith.cmpi ne, %15, %16 : vector<16x1xi32>
    %c0_i32_4 = arith.constant 0 : i32
    %18 = vector.broadcast %c0_i32_4 : i32 to vector<16x1xi32>
    %19 = arith.cmpi slt, %15, %18 : vector<16x1xi32>
    %c0_i32_5 = arith.constant 0 : i32
    %20 = arith.cmpi slt, %13, %c0_i32_5 : i32
    %21 = vector.broadcast %20 : i1 to vector<16x1xi1>
    %22 = vector.broadcast %21 : vector<16x1xi1> to vector<16x1xi1>
    %23 = arith.xori %19, %22 : vector<16x1xi1>
    %24 = arith.andi %23, %17 : vector<16x1xi1>
    %25 = vector.broadcast %13 : i32 to vector<16x1xi32>
    %26 = arith.addi %15, %25 : vector<16x1xi32>
    %27 = arith.select %24, %26, %15 : vector<16x1xi1>, vector<16x1xi32>
    %28 = tpu.iota {dimensions = array<i32: 1>} : vector<16x8xi32>
    %29 = vector.broadcast %27 : vector<16x1xi32> to vector<16x8xi32>
    %30 = arith.cmpi eq, %29, %28 : vector<16x8xi32>
    %31 = arith.extui %30 : vector<16x8xi1> to vector<16x8xi32>
    %32 = arith.sitofp %31 : vector<16x8xi32> to vector<16x8xf32>
    %c0_6 = arith.constant 0 : index
    %c0_7 = arith.constant 0 : index
    %33 = vector.load %arg3[%c0_6, %c0_7] : memref<8x128xf32, #tpu.memory_space<vmem>>, vector<8x128xf32>
    %cst_8 = arith.constant dense<0.000000e+00> : vector<16x128xf32>
    %34 = tpu.matmul %32, %33, %cst_8 {dimension_numbers = #tpu.dot_dimension_numbers<[1], [0], [0], [1], [0, 0, 1, 1], [], []>, precision = #tpu.contract_precision<fp32>} : vector<16x8xf32>, vector<8x128xf32>, vector<16x128xf32> -> vector<16x128xf32>
    %35 = arith.addf %8, %34 : vector<16x128xf32>
    %c0_9 = arith.constant 0 : index
    %c0_10 = arith.constant 0 : index
    %36 = vector.load %arg4[%c0_9, %c0_10] : memref<16x128xf32, #tpu.memory_space<vmem>>, vector<16x128xf32>
    tpu.vector_store %arg4[%c0_9, %c0_10], %35 {strides = array<i32>} : memref<16x128xf32, #tpu.memory_space<vmem>>, vector<16x128xf32>,
    return
  }
  func.func @transform_0(%arg0: i32) -> (i32, i32) {
    %c0_i32 = arith.constant 0 : i32
    %c0_i32_0 = arith.constant 0 : i32
    return %arg0, %c0_i32 : i32, i32
  }
  func.func @transform_1(%arg0: i32) -> (i32, i32) {
    %c0_i32 = arith.constant 0 : i32
    %c0_i32_0 = arith.constant 0 : i32
    %c0_i32_1 = arith.constant 0 : i32
    return %c0_i32, %c0_i32_0 : i32, i32
  }
  func.func @transform_2(%arg0: i32) -> (i32, i32) {
    %c0_i32 = arith.constant 0 : i32
    %c0_i32_0 = arith.constant 0 : i32
    %c0_i32_1 = arith.constant 0 : i32
    return %c0_i32, %c0_i32_0 : i32, i32
  }
  func.func @transform_3(%arg0: i32) -> (i32, i32) {
    %c0_i32 = arith.constant 0 : i32
    %c0_i32_0 = arith.constant 0 : i32
    return %arg0, %c0_i32 : i32, i32
  }
}

</mosaic_0001>

<bundles_post_ra>
// kernel: tpu_custom_call.1
= control target key start
LH: loop header
LB: loop body
LE: loop exit
PB: predicated region body
PF: predicated region fallthrough
CT: control target
= control target key end

     0   :  { %8 = vsyncpa [#allocation3], 0  ;;  %s1556_s0 = inlined_call_operand.vmem [shape: s32[16,1], index: 0, kind: input, shape index: {}]   ;;  %s1557_s1 = inlined_call_operand.hbm [shape: f32[32,128], index: 1, kind: input, shape index: {}]   ;;  %s1558_s2 = inlined_call_operand.vmem [shape: f32[8,128], index: 2, kind: input, shape index: {}]   ;;  %s1559_s3 = inlined_call_operand.hbm [shape: f32[16,128], index: 3, kind: output, shape index: {}]  }
   0x1   :  { %9 = vsyncpa [#allocation4], 0  ;;  %s1428_s12 = smov [#allocation2]   ;;  %s1380_s16 = scalar_lea.hbm %s1557_s1, 512 }
   0x2   :  { %s17_s13 = sshll.u32 %s1428_s12, 4  ;;  %p1381_p0 = scmp.ne.s32.totalorder %s1557_s1, %s1380_s16  ;;  %s18_s13 = int_to_ptr.vmem [resolvable:$true] %s17_s13 }
   0x3   :  { %p1384_p1 = scmp.lt.u32.totalorder %s1380_s16, %s1557_s1 }
   0x5   :  { %p1386_p2 = pnand %p1384_p1, %p1381_p0 }
   0x7   :  { %1389 = shalt.err (!%p1386_p2)
}
   0x8   :  { %s1390_s21 = scalar_lea.vmem %s18_s13, 512  ;;  %p1395_p4 = scmp.lt.s32.totalorder %s18_s13, %s18_s13 }
   0x9   :  { %p1391_p3 = scmp.ne.s32.totalorder %s18_s13, %s1390_s21  ;;  %p1396_p5 = scmp.lt.s32.totalorder %s1390_s21, %s1390_s21 }
   0xb   :  { %p1397_p6 = por %p1396_p5, %p1395_p4 }
   0xd   :  { %p1398_p7 = pnand %p1397_p6, %p1391_p3 }
   0xf   :  { %1401 = shalt.err (!%p1398_p7)
}
  0x10   :  { %s1429_s22 = smov 128   ;;  %s1430_s23 = smov 8  }
  0x11   :  { %23 = dma.hbm_to_vmem [thread:$0]  %s1557_s1, 512, %s18_s13, [#allocation3], %s1429_s22, %s1429_s22, %s1430_s23  }
  0x12   :  { %1424 = dma.done.wait [#allocation3], 512  }
  0x13   :  { %1425 = vsyncadd [#allocation3], 4294966784  ;;  %v32_v0 = vlaneseq  ;;  %v1431_v1 = vmov 0   ;;  %vm87_vm0 = vcmask 64512   ;;  %v30_v7 = vld [vmem:[%s1556_s0] sm:$0xff]  ;;  %v1432_v9 = vmov 0.0  }
  0x14   :  { %1379 = vset.pattern.permute.xlu0 %v1431_v1  ;;  %v86_v8 = vld [vmem:[%s1558_s2] sm:$0xff]  ;;  %v46_v13 = vld [vmem:[#allocation2] sm:$0xff]  ;;  %v48_v15 = vld [vmem:[#allocation2 + $0x10] sm:$0xff]  ;;  %vm583_vm3 = vcmask 261120  }
  0x15   :  { %v1469_v2 = vand.u32 127, %v32_v0  ;;  %v51_v3 = vshrl.u32 %v32_v0, 7  ;;  %35 = vperm.xlu0 %1379, %v30_v7   ;;  %v1481_v11 = vand.u32 4294901760, %v86_v8  ;;  %v47_v14 = vld [vmem:[#allocation2 + $0x8] sm:$0xff]  ;;  %v31_v16 = vld [vmem:[%s1556_s0 + $0x8] sm:$0xff]  ;;  %v591_v19 = vand.u32 4294901760, %v46_v13 }
  0x16   :  { %v594_v20 = vand.u32 4294901760, %v47_v14  ;;  %v49_v21 = vld [vmem:[#allocation2 + $0x18] sm:$0xff]  ;;  %v597_v24 = vand.u32 4294901760, %v48_v15  ;;  %s1433_s0 = smov [#allocation5]  }
  0x17   :  { %v60_v4 = vand.u32 7, %v51_v3  ;;  %v52_v5 = vadd.s32 8, %v51_v3  ;;  %v182_v22 = vsub.f32 %v86_v8, %v1481_v11  ;;  %1207 = vmatprep.subr.mxu1 %v1481_v11  ;;  %v600_v25 = vand.u32 4294901760, %v49_v21  ;;  %s1125_s30 = sshll.u32 %s1433_s0, 4  ;;  %s1126_s30 = int_to_ptr.vmem [resolvable:$true] %s1125_s30 }
  0x18   :  { %1208 = vmatpush3.msra.mxu1 %v1481_v11  ;;  %v1499_v28 = vpack.c.bf16 %v594_v20, %v591_v19  ;;  %v681_v29 = vsub.f32 %v46_v13, %v591_v19  ;;  %v688_v31 = vsub.f32 %v47_v14, %v594_v20  ;;  %v695_v36 = vsub.f32 %v48_v15, %v597_v24  ;;  %s1402_s4 = scalar_lea.vmem %s1126_s30, 256  ;;  %p1407_p9 = scmp.lt.s32.totalorder %s1126_s30, %s1126_s30 }
  0x19   :  { %vm80_vm1 = vcmp.eq.s32.totalorder %v60_v4, %v1469_v2  ;;  %v67_v6 = vand.u32 7, %v52_v5  ;;  %38 = vperm.xlu0 %1379, %v31_v16   ;;  %v183_v30 = vand.u32 4294901760, %v182_v22  ;;  %v702_v40 = vsub.f32 %v49_v21, %v600_v25  ;;  %p1403_p8 = scmp.ne.s32.totalorder %s1126_s30, %s1402_s4  ;;  %p1408_p10 = scmp.lt.s32.totalorder %s1402_s4, %s1402_s4 }
  0x1a   :  { %v1479_v10 = vsel %vm80_vm1, 1.0, %v1432_v9  ;;  %1304 = vmatprep.subr.bf16.mxu1 %v1499_v28  ;;  %v682_v35 = vand.u32 4294901760, %v681_v29  ;;  %v689_v39 = vand.u32 4294901760, %v688_v31  ;;  %v1502_v45 = vpack.c.bf16 %v600_v25, %v597_v24 }
  0x1b   :  { %1214 = vmatprep.mubr.msk.f32.mxu0 %vm87_vm0, %v1479_v10  ;;  %vm81_vm2 = vcmp.eq.s32.totalorder %v67_v6, %v1469_v2  ;;  %v89_v12 = vsel %vm87_vm0, %v1479_v10, 0  ;;  %v184_v34 = vsub.f32 %v182_v22, %v183_v30  ;;  %v696_v46 = vand.u32 4294901760, %v695_v36  ;;  %p1409_p11 = por %p1408_p10, %p1407_p9 }
  0x1c   :  { %v1492_v17 = vsel %vm81_vm2, 1.0, %v1432_v9  ;;  %v161_v18 = vsub.f32 %v89_v12, %v89_v12  ;;  %v683_v43 = vsub.f32 %v681_v29, %v682_v35  ;;  %v690_v44 = vsub.f32 %v688_v31, %v689_v39 }
  0x1d   :  { %v92_v23 = vsel %vm87_vm0, %v1492_v17, 0  ;;  %v185_v41 = vand.u32 4294901760, %v184_v34  ;;  %v703_v47 = vand.u32 4294901760, %v702_v40  ;;  %v697_v50 = vsub.f32 %v695_v36, %v696_v46  ;;  %p1410_p12 = pnand %p1409_p11, %p1403_p8 }
  0x1e   :  { %v171_v26 = vsub.f32 %v92_v23, %v92_v23  ;;  %v162_v27 = vand.u32 4294901760, %v161_v18  ;;  %v684_v48 = vand.u32 4294901760, %v683_v43  ;;  %v691_v49 = vand.u32 4294901760, %v690_v44 }
  0x1f   :  { %1212 = vmatprep.subr.mxu0 %v185_v41  ;;  %v704_v51 = vsub.f32 %v702_v40, %v703_v47  ;;  %v698_v53 = vand.u32 4294901760, %v697_v50  ;;  %v1319_v56 = vpack.c.bf16 %v688_v31, %v681_v29  ;;  %v1323_v57 = vpack.c.bf16 %v702_v40, %v695_v36 }
  0x20   :  { %v172_v32 = vand.u32 4294901760, %v171_v26  ;;  %v163_v33 = vsub.f32 %v161_v18, %v162_v27  ;;  %1213 = vmatpush3.msra.mxu0 %v185_v41  ;;  %v1311_v52 = vpack.c.bf16 %v691_v49, %v684_v48  ;;  %v1335_v58 = vpack.c.bf16 %v689_v39, %v682_v35 }
  0x21   :  { %1215 = vmatmul.mubr.msk.f32.vlgmr.msra.gmra.mrb[0].mxu0 %vm87_vm0, %v1492_v17  ;;  %1217 = vmatprep.subr.mxu0 %v182_v22  ;;  %v705_v54 = vand.u32 4294901760, %v704_v51  ;;  %v1339_v59 = vpack.c.bf16 %v703_v47, %v696_v46 }
  0x22   :  { %v164_v37 = vand.u32 4294901760, %v163_v33  ;;  %v173_v38 = vsub.f32 %v171_v26, %v172_v32  ;;  %1218 = vmatpush3.msra.mxu0 %v182_v22  ;;  %1219 = vmatprep.mubr.f32.mxu0 %v161_v18 }
  0x23   :  { %1222 = vmatprep.subr.mxu0 %v1481_v11  ;;  %v1315_v55 = vpack.c.bf16 %v705_v54, %v698_v53 }
  0x24   :  { %1209 = vmatprep.mubr.f32.mxu1 %v164_v37  ;;  %v174_v42 = vand.u32 4294901760, %v173_v38 }
  0x26   :  { %1210 = vmatmul.mubr.f32.vlgmr.msra.gmra.mrb[0].mxu1 %v174_v42 }
  0x27   :  { %1306 = vmatpush3.bf16.msra.mxu1 %v1499_v28 }
  0x28   :  { %1308 = vmatprep.subr.bf16.mxu1 %v1502_v45 }
  0x29   :  { %1220 = vmatmul.mubr.f32.vlgmr.msra.gmra.mrb[0].mxu0 %v171_v26 }
  0x2a   :  { %1223 = vmatpush3.msra.mxu0 %v1481_v11  ;;  %1224 = vmatprep.mubr.f32.mxu0 %v162_v27 }
  0x2b   :  { %1310 = vmatpush3.bf16.msra.mxu1 %v1502_v45  ;;  %1227 = vmatprep.subr.mxu0 %v183_v30 }
  0x2c   :  { %1312 = vmatprep.subr.bf16.mxu1 %v1311_v52 }
  0x31   :  { %1225 = vmatmul.mubr.f32.vlgmr.msra.gmra.mrb[0].mxu0 %v172_v32 }
  0x32   :  { %1228 = vmatpush3.msra.mxu0 %v183_v30  ;;  %1229 = vmatprep.mubr.msk.f32.mxu0 %vm87_vm0, %v1479_v10 }
  0x33   :  { %1232 = vmatprep.subr.mxu0 %v1481_v11 }
  0x39   :  { %1230 = vmatmul.mubr.msk.f32.vlgmr.msra.gmra.mrb[0].mxu0 %vm87_vm0, %v1492_v17 }
  0x3a   :  { %1233 = vmatpush3.msra.mxu0 %v1481_v11  ;;  %1234 = vmatprep.mubr.msk.f32.mxu0 %vm87_vm0, %v1479_v10 }
  0x3b   :  { %1336 = vmatprep.subr.bf16.mxu0 %v1335_v58 }
  0x41   :  { %1235 = vmatmul.mubr.msk.f32.vlgmr.msra.gmra.mrb[0].mxu0 %vm87_vm0, %v1492_v17 }
  0x42   :  { %1338 = vmatpush3.bf16.msra.mxu0 %v1335_v58 }
  0x43   :  { %1340 = vmatprep.subr.bf16.mxu0 %v1339_v59 }
  0x46   :  { %1342 = vmatpush3.bf16.msra.mxu0 %v1339_v59 }
  0x47   :  { %1344 = vmatprep.subr.bf16.mxu0 %v1499_v28 }
  0x94   :  { %v36_v60 = vpop.permute.xlu0 %35 }
  0x95   :  { %vm40_vm4 = vcmp.eq.s32.totalorder %v36_v60, %v1469_v2 }
  0x96   :  { %v1137_v61 = vsel %vm40_vm4, 1.0, %v1432_v9 }
  0x97   :  { %v585_v62 = vsel %vm583_vm3, %v1137_v61, 0  ;;  %1289 = vmatprep.mubr.msk.f32.mxu0 %vm583_vm3, %v1137_v61 }
  0x98   :  { %v660_v63 = vsub.f32 %v585_v62, %v585_v62  ;;  %v39_v0 = vpop.permute.xlu0 %38 }
  0x99   :  { %vm41_vm5 = vcmp.eq.s32.totalorder %v39_v0, %v1469_v2 }
  0x9a   :  { %v1138_v1 = vsel %vm41_vm5, 1.0, %v1432_v9  ;;  %v661_v3 = vand.u32 4294901760, %v660_v63 }
  0x9b   :  { %v588_v4 = vsel %vm583_vm3, %v1138_v1, 0  ;;  %1290 = vmatmul.mubr.msk.f32.vlgmr.msra.gmra.mrb[2].mxu0 %vm583_vm3, %v1138_v1 }
  0x9c   :  { %v670_v5 = vsub.f32 %v588_v4, %v588_v4  ;;  %1346 = vmatpush3.bf16.msra.mxu0 %v1499_v28  ;;  %1300 = vmatprep.mubr.msk.f32.mxu0 %vm583_vm3, %v1137_v61  ;;  %v662_v6 = vsub.f32 %v660_v63, %v661_v3 }
  0x9d   :  { %1348 = vmatprep.subr.bf16.mxu0 %v1502_v45 }
  0x9e   :  { %v663_v7 = vand.u32 4294901760, %v662_v6  ;;  %v671_v8 = vand.u32 4294901760, %v670_v5 }
  0xa0   :  { %1245 = vmatprep.mubr.f32.mxu1 %v663_v7  ;;  %1350 = vmatpush3.bf16.msra.mxu0 %v1502_v45  ;;  %v672_v2 = vsub.f32 %v670_v5, %v671_v8 }
  0xa2   :  { %v673_v9 = vand.u32 4294901760, %v672_v2 }
  0xa3   :  { %1301 = vmatmul.mubr.msk.f32.vlgmr.msra.gmra.mrb[2].mxu0 %vm583_vm3, %v1138_v1 }
  0xa4   :  { %1246 = vmatmul.mubr.f32.vlgmr.msra.gmra.mrb[2].mxu1 %v673_v9 }
  0xa5   :  { %1314 = vmatpush3.bf16.msra.mxu1 %v1311_v52  ;;  %1256 = vmatprep.mubr.msk.f32.mxu1 %vm583_vm3, %v1137_v61 }
  0xa6   :  { %1316 = vmatprep.subr.bf16.mxu1 %v1315_v55 }
  0xa9   :  { %1318 = vmatpush3.bf16.msra.mxu1 %v1315_v55 }
  0xaa   :  { %1320 = vmatprep.subr.bf16.mxu1 %v1319_v56 }
  0xac   :  { %1257 = vmatmul.mubr.msk.f32.vlgmr.msra.gmra.mrb[2].mxu1 %vm583_vm3, %v1138_v1 }
  0xad   :  { %1322 = vmatpush3.bf16.msra.mxu1 %v1319_v56  ;;  %1267 = vmatprep.mubr.f32.mxu1 %v660_v63 }
  0xae   :  { %1324 = vmatprep.subr.bf16.mxu1 %v1323_v57 }
  0xb1   :  { %1326 = vmatpush3.bf16.msra.mxu1 %v1323_v57 }
  0xb2   :  { %1328 = vmatprep.subr.bf16.mxu1 %v1499_v28 }
  0xb4   :  { %1268 = vmatmul.mubr.f32.vlgmr.msra.gmra.mrb[2].mxu1 %v670_v5 }
  0xb5   :  { %1330 = vmatpush3.bf16.msra.mxu1 %v1499_v28  ;;  %1278 = vmatprep.mubr.f32.mxu1 %v661_v3 }
  0xb6   :  { %1332 = vmatprep.subr.bf16.mxu1 %v1502_v45 }
  0xb9   :  { %1334 = vmatpush3.bf16.msra.mxu1 %v1502_v45 }
  0xbc   :  { %1279 = vmatmul.mubr.f32.vlgmr.msra.gmra.mrb[2].mxu1 %v671_v8 }
  0xf9   :  { %v1211_v10 = vpop.f32.mrb[0].mxu1 }
  0xfa   :  { %v166_v11 = vpop.f32.mrb[1].mxu1 }
 0x114   :  { %v1236_v12 = vpop.f32.mrb[0].mxu0 }
 0x115   :  { %v1351_v13 = vadd.f32 %v1236_v12, %v1211_v10  ;;  %v573_v14 = vpop.f32.mrb[1].mxu0 }
 0x116   :  { %v1354_v15 = vadd.f32 %v573_v14, %v166_v11 }
 0x176   :  { %v1302_v16 = vpop.f32.mrb[2].mxu0 }
 0x177   :  { %v1108_v17 = vpop.f32.mrb[3].mxu0 }
 0x18f   :  { %v1280_v18 = vpop.f32.mrb[2].mxu1 }
 0x190   :  { %v1352_v19 = vadd.f32 %v1351_v13, %v1280_v18  ;;  %v936_v20 = vpop.f32.mrb[3].mxu1 }
 0x191   :  { %v1355_v21 = vadd.f32 %v1354_v15, %v936_v20 }
 0x192   :  { %v1353_v22 = vadd.f32 %v1352_v19, %v1302_v16 }
 0x193   :  { %v1356_v23 = vadd.f32 %v1355_v21, %v1108_v17 }
 0x194   :  { %1119 = vst [vmem:[#allocation5 + $0x8] sm:$0xff] %v1353_v22 }
 0x195   :  { %1118 = vst [vmem:[#allocation5] sm:$0xff] %v1356_v23 }
 0x196   :  { %1413 = shalt.err (!%p1410_p12)
}
 0x197   :  { %s1414_s7 = scalar_lea.hbm %s1559_s3, 256 }
 0x198   :  { %p1415_p13 = scmp.ne.s32.totalorder %s1559_s3, %s1414_s7  ;;  %p1418_p0 = scmp.lt.u32.totalorder %s1414_s7, %s1559_s3 }
 0x19a   :  { %p1420_p1 = pnand %p1418_p0, %p1415_p13 }
 0x19c   :  { %1423 = shalt.err (!%p1420_p1)
}
 0x19d   :  { %1131 = dma.vmem_to_hbm [thread:$0]  %s1126_s30, 256, %s1559_s3, [#allocation4], %s1429_s22, %s1429_s22, %s1430_s23  }
 0x19e   :  { %1426 = dma.done.wait [#allocation4], 256  }
 0x19f   :  { %1427 = vsyncadd [#allocation4], 4294967040 }
 0x1a0   :  { %1135 = vsyncpa [#allocation3], 1 }
 0x1a1   :  { %1136 = vsyncpa [#allocation4], 1 }

</bundles_post_ra>
